<compile_context>
chip_gen: v6e
topology: v6e:2x2x1
jax: 0.10.0
libtpu: 0.0.40
codegen_flags: <defaults>
</compile_context>

<pallas_src>
import jax
import jax.numpy as jnp
import numpy as np
from jax.experimental import pallas as pl
from jax.experimental.pallas import tpu as pltpu

# ~3 MiB per stream block: 4 streams x 2 pipeline buffers ~= 24 MiB of VMEM
# (declared explicitly via vmem_limit_bytes), which is safe on v5e/v6e
# (128 MiB physical) and v7x (64 MiB physical) and deep in the HBM-roofline
# plateau (>85%) on all generations.
_TARGET_BLOCK_BYTES = 3 * 1024 * 1024
# Minimum grid steps we try to expose so v7x megacore can use both TCs.
_MIN_PARALLEL_STEPS = 4


def _rope_kernel(cos_ref, sin_a_ref, sin_b_ref, xa_ref, xb_ref, oa_ref, ob_ref):
    cos = cos_ref[...]      # (1, TC) f32: cos repeated per pair
    sin_a = sin_a_ref[...]  # (1, TC) f32: -sin on even lanes, 0 on odd
    sin_b = sin_b_ref[...]  # (1, TC) f32:  0 on even lanes, +sin on odd

    def rotate(x):
        x = x.astype(jnp.float32)                 # (TB, TC)
        x_up = jnp.roll(x, 1, axis=-1)            # x_up[j] = x[j-1]
        x_dn = jnp.roll(x, -1, axis=-1)           # x_dn[j] = x[j+1]
        # out[2i]   = x[2i]*cos - x[2i+1]*sin   (sin_a carries -sin, even lanes)
        # out[2i+1] = x[2i+1]*cos + x[2i]*sin   (sin_b carries +sin, odd lanes)
        # Wrap-around lanes at tile boundaries (tiles are always an even number
        # of columns wide) hit zero entries of sin_a / sin_b, so the flattened
        # (S*D) layout and column tiling are exact.
        return x * cos + x_dn * sin_a + x_up * sin_b

    oa_ref[...] = rotate(xa_ref[...]).astype(oa_ref.dtype)
    ob_ref[...] = rotate(xb_ref[...]).astype(ob_ref.dtype)


def make_freqs(head_dim: int, max_seq_len: int):
    """Precompute the rotation tables, each of shape (max_seq_len, head_dim).

    Returns:
      cos_full: [c0, c0, c1, c1, ...] per row
      sin_a:    [-s0, 0, -s1, 0, ...] per row
      sin_b:    [0, s0, 0, s1, ...]   per row
    """
    assert head_dim % 2 == 0, "RoPE requires an even head_dim"
    theta = 10000.0 ** (
        -2.0 * jnp.arange(0, head_dim, 2, dtype=jnp.float32) / head_dim)
    t = jnp.arange(max_seq_len, dtype=jnp.float32)
    freqs = t[:, None] * theta[None, :]                      # (S, D//2)
    cos = jnp.cos(freqs)
    sin = jnp.sin(freqs)
    zeros = jnp.zeros_like(sin)
    cos_full = jnp.repeat(cos, 2, axis=-1)                   # (S, D)
    sin_a = jnp.stack([-sin, zeros], axis=-1).reshape(max_seq_len, head_dim)
    sin_b = jnp.stack([zeros, sin], axis=-1).reshape(max_seq_len, head_dim)
    return cos_full, sin_a, sin_b


def _choose_tiles(n_rows, n_cols, itemsize, target_bytes=_TARGET_BLOCK_BYTES,
                  min_grid=_MIN_PARALLEL_STEPS):
    """Pick a (TB, TC) block obeying the (8, 128) rule and the VMEM budget.

    Preference order: (1) expose >= min_grid grid steps (v7x megacore),
    (2) wide column tiles (up to 1024 lanes -> long contiguous DMA rows),
    (3) largest block that fits the budget (amortize ~0.35 us/step overhead),
    (4) tie-break on the widest columns.
    """
    row_cands = sorted(
        {d for d in range(8, n_rows + 1, 8) if n_rows % d == 0} | {n_rows},
        reverse=True)
    if n_cols % 128 != 0:
        # TODO(synk): pad S*D to a multiple of 128 (masked edge tile) instead of
        # forcing a full-width block when the flattened width is ragged.
        col_cands = [n_cols]
    else:
        c = n_cols // 128
        col_cands = sorted({d * 128 for d in range(1, c + 1) if c % d == 0},
                           reverse=True)

    cands = [(tb, tc) for tc in col_cands for tb in row_cands
             if tb * tc * itemsize <= target_bytes]
    if not cands:
        # Nothing fits the budget (extreme ragged shapes): smallest legal block.
        return row_cands[-1], col_cands[-1]

    def score(cand):
        tb, tc = cand
        grid_steps = (n_rows // tb) * (n_cols // tc)
        return (grid_steps >= min_grid,   # enough steps for megacore sharding
                min(tc, 1024),            # >= 4 KiB contiguous per DMA row
                tb * tc,                  # biggest block within the budget
                tc)                       # tie-break: widest columns
    return max(cands, key=score)


@jax.jit
def qc_rope(xa, xb, cos_full, sin_a, sin_b):
    B, H, S, D = xa.shape
    assert xb.shape == xa.shape, "xa and xb must have the same shape"
    assert D % 2 == 0, "head_dim must be even"
    assert cos_full.shape[0] >= S and cos_full.shape[1] == D, (
        "rotation tables do not cover (seq_len, head_dim)")

    N = B * H
    M = S * D

    xa2 = xa.reshape(N, M)                      # free: contiguous collapse
    xb2 = xb.reshape(N, M)
    cos_f = cos_full[:S].reshape(1, M)
    sin_a_f = sin_a[:S].reshape(1, M)
    sin_b_f = sin_b[:S].reshape(1, M)

    TB, TC = _choose_tiles(N, M, itemsize=4)
    assert TC % 2 == 0, "tile boundaries must fall on even flattened columns"
    # Column axis OUTER, row axis INNER: the table block index only depends on
    # the outer axis, so its DMA is not re-issued on every inner step.
    grid = (M // TC, N // TB)

    x_spec = pl.BlockSpec((TB, TC), lambda c, r: (r, c))
    t_spec = pl.BlockSpec((1, TC), lambda c, r: (0, c))

    # Explicit scoped-VMEM budget derived from the tile choice (the v5e default
    # scoped limit is only 16 MiB): 2 pipeline buffers per stream, tables pad to
    # 8 sublanes, plus headroom for Mosaic internal scratch.
    in_item = jnp.dtype(xa.dtype).itemsize
    stream_bytes = TB * TC * (2 * in_item + 2 * 4)   # xa, xb in; oa, ob out (f32)
    table_bytes = 3 * 8 * TC * 4
    vmem_limit = int(2 * (stream_bytes + table_bytes) + (4 << 20))

    oa, ob = pl.pallas_call(
        _rope_kernel,
        out_shape=(jax.ShapeDtypeStruct((N, M), jnp.float32),
                   jax.ShapeDtypeStruct((N, M), jnp.float32)),
        grid=grid,
        in_specs=[t_spec, t_spec, t_spec, x_spec, x_spec],
        out_specs=[x_spec, x_spec],
        compiler_params=pltpu.CompilerParams(
            dimension_semantics=("parallel", "parallel"),
            vmem_limit_bytes=vmem_limit),
    )(cos_f, sin_a_f, sin_b_f, xa2, xb2)

    return oa.reshape(B, H, S, D), ob.reshape(B, H, S, D)


def qc_rope_reference(xa, xb, head_dim, seq_len):
    """Pure-JAX reference mirroring the PyTorch complex-multiply semantics."""
    theta = 10000.0 ** (
        -2.0 * jnp.arange(0, head_dim, 2, dtype=jnp.float32) / head_dim)
    t = jnp.arange(seq_len, dtype=jnp.float32)
    freqs = t[:, None] * theta[None, :]
    cos = jnp.cos(freqs)
    sin = jnp.sin(freqs)

    def apply(x):
        S = x.shape[2]
        xr = x.astype(jnp.float32).reshape(*x.shape[:-1], -1, 2)
        xe, xo = xr[..., 0], xr[..., 1]
        c = cos[:S][None, None]
        s = sin[:S][None, None]
        oe = xe * c - xo * s
        oo = xo * c + xe * s
        return jnp.stack([oe, oo], axis=-1).reshape(*x.shape[:-1], -1)

    return apply(xa), apply(xb)


def _run_case(B, H, S, D, seed):
    key = jax.random.PRNGKey(seed)
    ka, kb = jax.random.split(key)
    xa = jax.random.normal(ka, (B, H, S, D), dtype=jnp.float32)
    xb = jax.random.normal(kb, (B, H, S, D), dtype=jnp.float32)

    cos_full, sin_a, sin_b = make_freqs(D, S)
    oa, ob = qc_rope(xa, xb, cos_full, sin_a, sin_b)
    jax.block_until_ready((oa, ob))

    ra, rb = qc_rope_reference(xa, xb, D, S)
    np.testing.assert_allclose(np.asarray(oa), np.asarray(ra), rtol=1e-5, atol=1e-5)
    np.testing.assert_allclose(np.asarray(ob), np.asarray(rb), rtol=1e-5, atol=1e-5)


if __name__ == "__main__":
    # Small shape implied by the module (batch=2, heads=4, seq=8, head_dim=32).
    _run_case(B=2, H=4, S=8, D=32, seed=0)
    # Larger shape that forces a multi-block grid on BOTH axes (TB < N, TC < M),
    # validating the wrap-lane-zero trick at internal tile boundaries.
    _run_case(B=2, H=8, S=16, D=128, seed=1)

    print("KERNEL_OK")
</pallas_src>

<mosaic_0001>
module attributes {stable_mosaic.version = 11 : i64} {
  func.func @_rope_kernel(%arg0: i32, %arg1: i32, %arg2: memref<1x256xf32, #tpu.memory_space<vmem>>, %arg3: memref<1x256xf32, #tpu.memory_space<vmem>>, %arg4: memref<1x256xf32, #tpu.memory_space<vmem>>, %arg5: memref<8x256xf32, #tpu.memory_space<vmem>>, %arg6: memref<8x256xf32, #tpu.memory_space<vmem>>, %arg7: memref<8x256xf32, #tpu.memory_space<vmem>>, %arg8: memref<8x256xf32, #tpu.memory_space<vmem>>) attributes {dimension_semantics = [#tpu.dimension_semantics<parallel>, #tpu.dimension_semantics<parallel>], iteration_bounds = array<i64: 1, 1>, scalar_prefetch = 0 : i64, scratch_operands = 0 : i64, tpu.core_type = #tpu.core_type<tc>, window_params = [{transform_indices = @transform_0, window_bounds = array<i64: 1, 256>}, {transform_indices = @transform_1, window_bounds = array<i64: 1, 256>}, {transform_indices = @transform_2, window_bounds = array<i64: 1, 256>}, {transform_indices = @transform_3, window_bounds = array<i64: 8, 256>}, {transform_indices = @transform_4, window_bounds = array<i64: 8, 256>}, {transform_indices = @transform_5, window_bounds = array<i64: 8, 256>}, {transform_indices = @transform_6, window_bounds = array<i64: 8, 256>}]} {
    %c0 = arith.constant 0 : index
    %c0_0 = arith.constant 0 : index
    %0 = vector.load %arg2[%c0, %c0_0] : memref<1x256xf32, #tpu.memory_space<vmem>>, vector<1x256xf32>
    %c0_1 = arith.constant 0 : index
    %c0_2 = arith.constant 0 : index
    %1 = vector.load %arg3[%c0_1, %c0_2] : memref<1x256xf32, #tpu.memory_space<vmem>>, vector<1x256xf32>
    %c0_3 = arith.constant 0 : index
    %c0_4 = arith.constant 0 : index
    %2 = vector.load %arg4[%c0_3, %c0_4] : memref<1x256xf32, #tpu.memory_space<vmem>>, vector<1x256xf32>
    %c0_5 = arith.constant 0 : index
    %c0_6 = arith.constant 0 : index
    %3 = vector.load %arg5[%c0_5, %c0_6] : memref<8x256xf32, #tpu.memory_space<vmem>>, vector<8x256xf32>
    %4 = vector.extract_strided_slice %3 {offsets = [0, 255], sizes = [8, 1], strides = [1, 1]} : vector<8x256xf32> to vector<8x1xf32>
    %5 = vector.extract_strided_slice %3 {offsets = [0, 0], sizes = [8, 255], strides = [1, 1]} : vector<8x256xf32> to vector<8x255xf32>
    %6 = tpu.concatenate %4, %5 in 1 : vector<8x1xf32>, vector<8x255xf32> -> vector<8x256xf32>
    %7 = vector.extract_strided_slice %3 {offsets = [0, 1], sizes = [8, 255], strides = [1, 1]} : vector<8x256xf32> to vector<8x255xf32>
    %8 = vector.extract_strided_slice %3 {offsets = [0, 0], sizes = [8, 1], strides = [1, 1]} : vector<8x256xf32> to vector<8x1xf32>
    %9 = tpu.concatenate %7, %8 in 1 : vector<8x255xf32>, vector<8x1xf32> -> vector<8x256xf32>
    %10 = vector.broadcast %0 : vector<1x256xf32> to vector<8x256xf32>
    %11 = arith.mulf %3, %10 : vector<8x256xf32>
    %12 = vector.broadcast %1 : vector<1x256xf32> to vector<8x256xf32>
    %13 = arith.mulf %9, %12 : vector<8x256xf32>
    %14 = arith.addf %11, %13 : vector<8x256xf32>
    %15 = vector.broadcast %2 : vector<1x256xf32> to vector<8x256xf32>
    %16 = arith.mulf %6, %15 : vector<8x256xf32>
    %17 = arith.addf %14, %16 : vector<8x256xf32>
    %c0_7 = arith.constant 0 : index
    %c0_8 = arith.constant 0 : index
    %18 = vector.load %arg7[%c0_7, %c0_8] : memref<8x256xf32, #tpu.memory_space<vmem>>, vector<8x256xf32>
    tpu.vector_store %arg7[%c0_7, %c0_8], %17 {strides = array<i32>} : memref<8x256xf32, #tpu.memory_space<vmem>>, vector<8x256xf32>,
    %c0_9 = arith.constant 0 : index
    %c0_10 = arith.constant 0 : index
    %19 = vector.load %arg6[%c0_9, %c0_10] : memref<8x256xf32, #tpu.memory_space<vmem>>, vector<8x256xf32>
    %20 = vector.extract_strided_slice %19 {offsets = [0, 255], sizes = [8, 1], strides = [1, 1]} : vector<8x256xf32> to vector<8x1xf32>
    %21 = vector.extract_strided_slice %19 {offsets = [0, 0], sizes = [8, 255], strides = [1, 1]} : vector<8x256xf32> to vector<8x255xf32>
    %22 = tpu.concatenate %20, %21 in 1 : vector<8x1xf32>, vector<8x255xf32> -> vector<8x256xf32>
    %23 = vector.extract_strided_slice %19 {offsets = [0, 1], sizes = [8, 255], strides = [1, 1]} : vector<8x256xf32> to vector<8x255xf32>
    %24 = vector.extract_strided_slice %19 {offsets = [0, 0], sizes = [8, 1], strides = [1, 1]} : vector<8x256xf32> to vector<8x1xf32>
    %25 = tpu.concatenate %23, %24 in 1 : vector<8x255xf32>, vector<8x1xf32> -> vector<8x256xf32>
    %26 = vector.broadcast %0 : vector<1x256xf32> to vector<8x256xf32>
    %27 = arith.mulf %19, %26 : vector<8x256xf32>
    %28 = vector.broadcast %1 : vector<1x256xf32> to vector<8x256xf32>
    %29 = arith.mulf %25, %28 : vector<8x256xf32>
    %30 = arith.addf %27, %29 : vector<8x256xf32>
    %31 = vector.broadcast %2 : vector<1x256xf32> to vector<8x256xf32>
    %32 = arith.mulf %22, %31 : vector<8x256xf32>
    %33 = arith.addf %30, %32 : vector<8x256xf32>
    %c0_11 = arith.constant 0 : index
    %c0_12 = arith.constant 0 : index
    %34 = vector.load %arg8[%c0_11, %c0_12] : memref<8x256xf32, #tpu.memory_space<vmem>>, vector<8x256xf32>
    tpu.vector_store %arg8[%c0_11, %c0_12], %33 {strides = array<i32>} : memref<8x256xf32, #tpu.memory_space<vmem>>, vector<8x256xf32>,
    return
  }
  func.func @transform_0(%arg0: i32, %arg1: i32) -> (i32, i32) {
    %c0_i32 = arith.constant 0 : i32
    %c0_i32_0 = arith.constant 0 : i32
    return %c0_i32, %arg0 : i32, i32
  }
  func.func @transform_1(%arg0: i32, %arg1: i32) -> (i32, i32) {
    %c0_i32 = arith.constant 0 : i32
    %c0_i32_0 = arith.constant 0 : i32
    return %c0_i32, %arg0 : i32, i32
  }
  func.func @transform_2(%arg0: i32, %arg1: i32) -> (i32, i32) {
    %c0_i32 = arith.constant 0 : i32
    %c0_i32_0 = arith.constant 0 : i32
    return %c0_i32, %arg0 : i32, i32
  }
  func.func @transform_3(%arg0: i32, %arg1: i32) -> (i32, i32) {
    %c0_i32 = arith.constant 0 : i32
    return %arg1, %arg0 : i32, i32
  }
  func.func @transform_4(%arg0: i32, %arg1: i32) -> (i32, i32) {
    %c0_i32 = arith.constant 0 : i32
    return %arg1, %arg0 : i32, i32
  }
  func.func @transform_5(%arg0: i32, %arg1: i32) -> (i32, i32) {
    %c0_i32 = arith.constant 0 : i32
    return %arg1, %arg0 : i32, i32
  }
  func.func @transform_6(%arg0: i32, %arg1: i32) -> (i32, i32) {
    %c0_i32 = arith.constant 0 : i32
    return %arg1, %arg0 : i32, i32
  }
}

</mosaic_0001>

<bundles_post_ra>
// kernel: qc_rope.1
= control target key start
LH: loop header
LB: loop body
LE: loop exit
PB: predicated region body
PF: predicated region fallthrough
CT: control target
= control target key end

     0   :  { %s138_s25 = smov 127   ;;  %s139_s30 = smov 1   ;;  %v50_v4 = vlaneseq  ;;  %vm43_vm0 = vcmask 1039360   ;;  %vm34_vm1 = vcmask 7168   ;;  %s212_s4 = inlined_call_operand.vmem [shape: f32[8,256], index: 4, kind: input, shape index: {}]   ;;  %s213_s3 = inlined_call_operand.vmem [shape: f32[8,256], index: 3, kind: input, shape index: {}]   ;;  %s214_s0 = inlined_call_operand.vmem [shape: f32[1,256], index: 0, kind: input, shape index: {}]   ;;  %s215_s1 = inlined_call_operand.vmem [shape: f32[1,256], index: 1, kind: input, shape index: {}]   ;;  %s216_s2 = inlined_call_operand.vmem [shape: f32[1,256], index: 2, kind: input, shape index: {}]   ;;  %s217_s5 = inlined_call_operand.vmem [shape: f32[8,256], index: 5, kind: output, shape index: {0}]   ;;  %s218_s6 = inlined_call_operand.vmem [shape: f32[8,256], index: 6, kind: output, shape index: {1}]  }
   0x1   :  { %v94_v0 = vld [vmem:[%s212_s4] sm:$0xff]  ;;  %v95_v2 = vld [vmem:[%s212_s4 + $0x8] sm:$0xff] }
   0x2   :  { %v25_v1 = vld [vmem:[%s213_s3] sm:$0xff]  ;;  %107 = vrot.lane.b32.xlu1 %v94_v0, %s138_s25  ;;  %v26_v3 = vld [vmem:[%s213_s3 + $0x8] sm:$0xff]  ;;  %v51_v5 = vshrl.u32 %v50_v4, 7 }
   0x3   :  { %39 = vrot.lane.b32.xlu0 %v25_v1, %s138_s25  ;;  %v22_v8 = vld [vmem:[%s214_s0] sm:$0x3] }
   0x4   :  { %v52_v6 = vsub.s32 0, %v51_v5  ;;  %v56_v7 = vsub.s32 1, %v51_v5  ;;  %v23_v9 = vld [vmem:[%s215_s1] sm:$0x3] }
   0x5   :  { %v24_v14 = vld [vmem:[%s216_s2] sm:$0x3] }
   0x6   :  { %109 = vrot.lane.b32.xlu1 %v95_v2, %s138_s25  ;;  %v53_v12 = vrot.slane %v22_v8, %v52_v6  ;;  %v57_v13 = vrot.slane %v22_v8, %v56_v7  ;;  %v66_v15 = vrot.slane %v23_v9, %v52_v6  ;;  %v70_v16 = vrot.slane %v23_v9, %v56_v7 }
   0x7   :  { %41 = vrot.lane.b32.xlu0 %v26_v3, %s138_s25  ;;  %v81_v19 = vrot.slane %v24_v14, %v52_v6  ;;  %v85_v20 = vrot.slane %v24_v14, %v56_v7 }
   0x8   :  { %v60_v21 = vmul.f32 %v53_v12, %v25_v1  ;;  %v61_v22 = vmul.f32 %v57_v13, %v26_v3  ;;  %v116_v29 = vmul.f32 %v94_v0, %v53_v12  ;;  %v117_v30 = vmul.f32 %v95_v2, %v57_v13 }
   0xa   :  { %32 = vrot.lane.b32.xlu1 %v25_v1, %s139_s30 }
   0xb   :  { %28 = vrot.lane.b32.xlu0 %v26_v3, %s139_s30 }
   0xe   :  { %101 = vrot.lane.b32.xlu1 %v94_v0, %s139_s30 }
   0xf   :  { %97 = vrot.lane.b32.xlu0 %v95_v2, %s139_s30 }
  0x74   :  { %v108_v10 = vpop.permute.xlu1 %107 }
  0x75   :  { %v40_v11 = vpop.permute.xlu0 %39 }
  0x78   :  { %v110_v17 = vpop.permute.xlu1 %109 }
  0x79   :  { %v42_v18 = vpop.permute.xlu0 %41  ;;  %v111_v25 = vsel %vm43_vm0, %v108_v10, %v110_v17  ;;  %v115_v26 = vsel %vm43_vm0, %v110_v17, %v108_v10 }
  0x7a   :  { %v44_v23 = vsel %vm43_vm0, %v40_v11, %v42_v18  ;;  %v48_v24 = vsel %vm43_vm0, %v42_v18, %v40_v11  ;;  %v118_v33 = vmul.f32 %v111_v25, %v66_v15  ;;  %v119_v34 = vmul.f32 %v115_v26, %v70_v16 }
  0x7b   :  { %v73_v27 = vmul.f32 %v66_v15, %v44_v23  ;;  %v74_v28 = vmul.f32 %v70_v16, %v48_v24 }
  0x7c   :  { %v33_v31 = vpop.permute.xlu1 %32  ;;  %v120_v47 = vadd.f32 %v118_v33, %v116_v29  ;;  %v121_v48 = vadd.f32 %v119_v34, %v117_v30 }
  0x7d   :  { %v29_v32 = vpop.permute.xlu0 %28  ;;  %v75_v37 = vadd.f32 %v73_v27, %v60_v21  ;;  %v76_v38 = vadd.f32 %v74_v28, %v61_v22 }
  0x7e   :  { %v35_v35 = vsel %vm34_vm1, %v33_v31, %v29_v32  ;;  %v38_v36 = vsel %vm34_vm1, %v29_v32, %v33_v31 }
  0x7f   :  { %v88_v39 = vmul.f32 %v81_v19, %v38_v36  ;;  %v89_v40 = vmul.f32 %v85_v20, %v35_v35 }
  0x80   :  { %v102_v43 = vpop.permute.xlu1 %101 }
  0x81   :  { %v90_v41 = vadd.f32 %v88_v39, %v75_v37  ;;  %v91_v42 = vadd.f32 %v89_v40, %v76_v38  ;;  %v98_v44 = vpop.permute.xlu0 %97 }
  0x82   :  { %v103_v45 = vsel %vm34_vm1, %v102_v43, %v98_v44  ;;  %v106_v46 = vsel %vm34_vm1, %v98_v44, %v102_v43 }
  0x83   :  { %92 = vst [vmem:[%s217_s5] sm:$0xff] %v90_v41  ;;  %93 = vst [vmem:[%s217_s5 + $0x8] sm:$0xff] %v91_v42  ;;  %v122_v49 = vmul.f32 %v106_v46, %v81_v19  ;;  %v123_v50 = vmul.f32 %v103_v45, %v85_v20 }
  0x85   :  { %v124_v51 = vadd.f32 %v122_v49, %v120_v47  ;;  %v125_v52 = vadd.f32 %v123_v50, %v121_v48 }
  0x87   :  { %126 = vst [vmem:[%s218_s6] sm:$0xff] %v124_v51  ;;  %127 = vst [vmem:[%s218_s6 + $0x8] sm:$0xff] %v125_v52 }

</bundles_post_ra>
